<compile_context>
chip_gen: v7x
topology: tpu7x:2x2x1
jax: 0.10.0
libtpu: 0.0.40
codegen_flags: <defaults>
</compile_context>

<pallas_src>
import jax
import jax.numpy as jnp
from jax.experimental import pallas as pl
from jax.experimental.pallas import tpu as pltpu


def _round_up(x: int, m: int) -> int:
    return ((x + m - 1) // m) * m


def make_srdgcn_kernel(f_in: int):
    """Kernel closed over the (static) position of the folded ones-column."""

    def kernel(x_ref, adj_ref, w_ref, b_ref, o_ref):
        x = x_ref[...]          # (bb, Np, Fp_in); lane f_in holds 1.0 (row-sum fold)
        adj = adj_ref[...]      # (bb, Np, Np)
        w = w_ref[...]          # (Fp_in, Fp_out); rows >= f_in are zero
        bias = b_ref[...]       # (1, Fp_out);    cols >= F_out are zero

        bb, n, fp_in = x.shape
        fp_out = w.shape[1]

        # Ax_aug = adj @ [x | 1 | 0...]  — one batched MXU pass.
        # Lane f_in of the result carries sum(adj, -1) for free.
        ax = jnp.einsum('bnm,bmf->bnf', adj, x,
                        preferred_element_type=jnp.float32)

        # Single lane-dense (bb*Np, Fp_in) @ (Fp_in, Fp_out) MXU pass + bias.
        ax2 = ax.reshape(bb * n, fp_in)
        axw = jnp.dot(ax2, w, preferred_element_type=jnp.float32) + bias

        # GCN degree normalization: denom = sum(adj, -1) + 1 (already in lane f_in).
        denom = ax2[:, f_in:f_in + 1] + 1.0           # (bb*Np, 1)
        out = jnp.maximum(axw / denom, 0.0)           # ReLU
        # TODO(synk): self.gcn_drop (nn.Dropout) treated as identity (eval / p=0).

        o_ref[...] = out.reshape(bb, n, fp_out).astype(o_ref.dtype)

    return kernel


def _pick_batch_block(B: int, Np: int, Fp_in: int, Fp_out: int,
                      budget_bytes: int = 8 << 20) -> int:
    """Largest divisor of B that (a) fits a double-buffered VMEM budget and
    (b) leaves >= 2 grid steps when B >= 2 (v7x megacore)."""
    per = 4 * Np * (Fp_in + Np + Fp_out)          # f32 bytes per batch element
    bb = max(1, budget_bytes // (2 * per))
    if B >= 2:
        bb = min(bb, B // 2)
    bb = int(max(1, min(bb, B)))
    while B % bb:
        bb -= 1
    return bb


def srdgcn_forward(x, adj, weight, bias,
                   dep_dist_adj=None, key_padding_mask=None, aspect_mask=None,
                   *, batch_block=None):
    """Pallas SRDGCN layer.

    x: (B, N, F_in), adj: (B, N, N),
    weight: (F_out, F_in) (torch nn.Linear layout), bias: (F_out,).
    dep_dist_adj / key_padding_mask / aspect_mask are accepted for signature
    parity but unused, exactly as in the reference forward.
    """
    del dep_dist_adj, key_padding_mask, aspect_mask  # unused by the reference forward

    B, N, F_in = x.shape
    F_out = weight.shape[0]

    Np = _round_up(N, 8)
    Fp_in = _round_up(F_in + 1, 128)      # +1 lane for the folded ones-column
    Fp_out = _round_up(F_out, 128)

    # ---- wrapper-side padding (layout plumbing, zero extra compute) ----
    x_p = jnp.zeros((B, Np, Fp_in), jnp.float32)
    x_p = x_p.at[:, :N, :F_in].set(x.astype(jnp.float32))
    x_p = x_p.at[:, :N, F_in].set(1.0)    # ones column -> folds sum(adj,-1) into the MXU

    adj_p = jnp.zeros((B, Np, Np), jnp.float32)
    adj_p = adj_p.at[:, :N, :N].set(adj.astype(jnp.float32))

    w_p = jnp.zeros((Fp_in, Fp_out), jnp.float32)
    w_p = w_p.at[:F_in, :F_out].set(weight.T.astype(jnp.float32))

    b_p = jnp.zeros((1, Fp_out), jnp.float32)
    b_p = b_p.at[0, :F_out].set(bias.astype(jnp.float32))

    bb = batch_block if batch_block is not None else _pick_batch_block(
        B, Np, Fp_in, Fp_out)
    assert B % bb == 0, "batch_block must divide B"
    grid = (B // bb,)

    # Explicit scoped-VMEM sizing (double-buffered per-batch blocks + weights).
    per_step = 4 * bb * Np * (Fp_in + Np + Fp_out)
    need = 2 * per_step + 4 * (Fp_in * Fp_out + Fp_out)
    vmem_limit = int(min(64 * 1024 * 1024, max(32 * 1024 * 1024, 2 * need)))

    kernel = make_srdgcn_kernel(F_in)

    out_p = pl.pallas_call(
        kernel,
        out_shape=jax.ShapeDtypeStruct((B, Np, Fp_out), jnp.float32),
        grid_spec=pltpu.PrefetchScalarGridSpec(
            num_scalar_prefetch=0,
            grid=grid,
            in_specs=[
                pl.BlockSpec((bb, Np, Fp_in), lambda i: (i, 0, 0)),
                pl.BlockSpec((bb, Np, Np), lambda i: (i, 0, 0)),
                pl.BlockSpec((Fp_in, Fp_out), lambda i: (0, 0)),
                pl.BlockSpec((1, Fp_out), lambda i: (0, 0)),
            ],
            out_specs=pl.BlockSpec((bb, Np, Fp_out), lambda i: (i, 0, 0)),
        ),
        compiler_params=pltpu.CompilerParams(
            dimension_semantics=("parallel",),
            vmem_limit_bytes=vmem_limit),
    )(x_p, adj_p, w_p, b_p)

    return out_p[:, :N, :F_out].astype(x.dtype)


def srdgcn_reference(x, adj, weight, bias):
    """Pure-JAX reference mirroring the PyTorch forward (dropout = identity)."""
    denom = jnp.sum(adj, axis=-1, keepdims=True) + 1.0
    Ax = jnp.matmul(adj, x)
    AxW = jnp.matmul(Ax, weight.T) + bias
    AxW = AxW / denom
    return jax.nn.relu(AxW)


if __name__ == "__main__":
    # Small shapes consistent with the module: batch=2, N=8 tokens,
    # in_features=16, out_features=16.
    B, N, F_in, F_out = 2, 8, 16, 16

    key = jax.random.PRNGKey(0)
    k_x, k_adj, k_w, k_b = jax.random.split(key, 4)

    x = jax.random.normal(k_x, (B, N, F_in), jnp.float32)
    # Random 0/1 adjacency with self-loops (typical dependency-graph input).
    adj = (jax.random.uniform(k_adj, (B, N, N)) > 0.5).astype(jnp.float32)
    adj = jnp.maximum(adj, jnp.eye(N, dtype=jnp.float32)[None])

    # nn.Linear-style parameters (deterministic).
    bound = 1.0 / (F_in ** 0.5)
    weight = jax.random.uniform(k_w, (F_out, F_in), jnp.float32, -bound, bound)
    bias = jax.random.uniform(k_b, (F_out,), jnp.float32, -bound, bound)

    out = srdgcn_forward(x, adj, weight, bias)
    out = jax.block_until_ready(out)

    ref = srdgcn_reference(x, adj, weight, bias)
    assert out.shape == (B, N, F_out)
    assert jnp.allclose(out, ref, atol=1e-4, rtol=1e-4), "mismatch vs reference"

    print("KERNEL_OK")
</pallas_src>

<mosaic_0001>
module attributes {stable_mosaic.version = 11 : i64} {
  func.func @kernel(%arg0: i32, %arg1: memref<1x8x128xf32, #tpu.memory_space<vmem>>, %arg2: memref<1x8x8xf32, #tpu.memory_space<vmem>>, %arg3: memref<128x128xf32, #tpu.memory_space<vmem>>, %arg4: memref<1x128xf32, #tpu.memory_space<vmem>>, %arg5: memref<1x8x128xf32, #tpu.memory_space<vmem>>) attributes {dimension_semantics = [#tpu.dimension_semantics<parallel>], iteration_bounds = array<i64: 2>, scalar_prefetch = 0 : i64, scratch_operands = 0 : i64, tpu.core_type = #tpu.core_type<tc>, window_params = [{transform_indices = @transform_0, window_bounds = array<i64: 1, 8, 128>}, {transform_indices = @transform_1, window_bounds = array<i64: 1, 8, 8>}, {pipeline_mode = #tpu.pipeline_mode<synchronous>, transform_indices = @transform_2, window_bounds = array<i64: 128, 128>}, {pipeline_mode = #tpu.pipeline_mode<synchronous>, transform_indices = @transform_3, window_bounds = array<i64: 1, 128>}, {transform_indices = @transform_4, window_bounds = array<i64: 1, 8, 128>}]} {
    %c0 = arith.constant 0 : index
    %c0_0 = arith.constant 0 : index
    %c0_1 = arith.constant 0 : index
    %0 = vector.load %arg1[%c0, %c0_0, %c0_1] : memref<1x8x128xf32, #tpu.memory_space<vmem>>, vector<1x8x128xf32>
    %c0_2 = arith.constant 0 : index
    %c0_3 = arith.constant 0 : index
    %c0_4 = arith.constant 0 : index
    %1 = vector.load %arg2[%c0_2, %c0_3, %c0_4] : memref<1x8x8xf32, #tpu.memory_space<vmem>>, vector<1x8x8xf32>
    %c0_5 = arith.constant 0 : index
    %c0_6 = arith.constant 0 : index
    %2 = vector.load %arg3[%c0_5, %c0_6] : memref<128x128xf32, #tpu.memory_space<vmem>>, vector<128x128xf32>
    %c0_7 = arith.constant 0 : index
    %c0_8 = arith.constant 0 : index
    %3 = vector.load %arg4[%c0_7, %c0_8] : memref<1x128xf32, #tpu.memory_space<vmem>>, vector<1x128xf32>
    "tpu.trace_start"() <{level = 10 : i32, message = "bnm,bmf->bnf"}> : () -> ()
    %cst = arith.constant dense<0.000000e+00> : vector<1x8x128xf32>
    %4 = tpu.matmul %1, %0, %cst {dimension_numbers = #tpu.dot_dimension_numbers<[2], [1], [1], [2], [0, 0, 0, 1, 1, 2], [0], [0]>} : vector<1x8x8xf32>, vector<1x8x128xf32>, vector<1x8x128xf32> -> vector<1x8x128xf32>
    "tpu.trace_stop"() : () -> ()
    %5 = vector.shape_cast %4 : vector<1x8x128xf32> to vector<8x128xf32>
    %cst_9 = arith.constant dense<0.000000e+00> : vector<8x128xf32>
    %6 = tpu.matmul %5, %2, %cst_9 {dimension_numbers = #tpu.dot_dimension_numbers<[1], [0], [0], [1], [0, 0, 1, 1], [], []>} : vector<8x128xf32>, vector<128x128xf32>, vector<8x128xf32> -> vector<8x128xf32>
    %7 = vector.broadcast %3 : vector<1x128xf32> to vector<8x128xf32>
    %8 = arith.addf %6, %7 : vector<8x128xf32>
    %9 = vector.extract_strided_slice %5 {offsets = [0, 16], sizes = [8, 1], strides = [1, 1]} : vector<8x128xf32> to vector<8x1xf32>
    %cst_10 = arith.constant 1.000000e+00 : f32
    %10 = vector.broadcast %cst_10 : f32 to vector<8x1xf32>
    %11 = arith.addf %9, %10 : vector<8x1xf32>
    %12 = vector.broadcast %11 : vector<8x1xf32> to vector<8x128xf32>
    %13 = arith.divf %8, %12 : vector<8x128xf32>
    %cst_11 = arith.constant 0.000000e+00 : f32
    %14 = vector.broadcast %cst_11 : f32 to vector<8x128xf32>
    %15 = arith.maximumf %13, %14 : vector<8x128xf32>
    %16 = vector.shape_cast %15 : vector<8x128xf32> to vector<1x8x128xf32>
    %c0_12 = arith.constant 0 : index
    %c0_13 = arith.constant 0 : index
    %c0_14 = arith.constant 0 : index
    %17 = vector.load %arg5[%c0_12, %c0_13, %c0_14] : memref<1x8x128xf32, #tpu.memory_space<vmem>>, vector<1x8x128xf32>
    tpu.vector_store %arg5[%c0_12, %c0_13, %c0_14], %16 {strides = array<i32>} : memref<1x8x128xf32, #tpu.memory_space<vmem>>, vector<1x8x128xf32>,
    return
  }
  func.func @transform_0(%arg0: i32) -> (i32, i32, i32) {
    %c0_i32 = arith.constant 0 : i32
    %c0_i32_0 = arith.constant 0 : i32
    %c0_i32_1 = arith.constant 0 : i32
    return %arg0, %c0_i32, %c0_i32_0 : i32, i32, i32
  }
  func.func @transform_1(%arg0: i32) -> (i32, i32, i32) {
    %c0_i32 = arith.constant 0 : i32
    %c0_i32_0 = arith.constant 0 : i32
    %c0_i32_1 = arith.constant 0 : i32
    return %arg0, %c0_i32, %c0_i32_0 : i32, i32, i32
  }
  func.func @transform_2(%arg0: i32) -> (i32, i32) {
    %c0_i32 = arith.constant 0 : i32
    %c0_i32_0 = arith.constant 0 : i32
    %c0_i32_1 = arith.constant 0 : i32
    return %c0_i32, %c0_i32_0 : i32, i32
  }
  func.func @transform_3(%arg0: i32) -> (i32, i32) {
    %c0_i32 = arith.constant 0 : i32
    %c0_i32_0 = arith.constant 0 : i32
    %c0_i32_1 = arith.constant 0 : i32
    return %c0_i32, %c0_i32_0 : i32, i32
  }
  func.func @transform_4(%arg0: i32) -> (i32, i32, i32) {
    %c0_i32 = arith.constant 0 : i32
    %c0_i32_0 = arith.constant 0 : i32
    %c0_i32_1 = arith.constant 0 : i32
    return %arg0, %c0_i32, %c0_i32_0 : i32, i32, i32
  }
}

</mosaic_0001>

<bundles_post_ra>
// kernel: tpu_custom_call.1
= control target key start
LH: loop header
LB: loop body
LE: loop exit
PB: predicated region body
PF: predicated region fallthrough
CT: control target
= control target key end

     0   :  { %s1169_s0 = inlined_call_operand.hbm [shape: f32[2,8,128], index: 0, kind: input, shape index: {}]   ;;  %s1170_s1 = inlined_call_operand.hbm [shape: f32[2,8,8], index: 1, kind: input, shape index: {}]   ;;  %s1171_s2 = inlined_call_operand.hbm [shape: f32[128,128], index: 2, kind: input, shape index: {}]   ;;  %s1172_s3 = inlined_call_operand.vmem [shape: f32[1,128], index: 3, kind: input, shape index: {}]   ;;  %s1173_s4 = inlined_call_operand.hbm [shape: f32[2,8,128], index: 4, kind: output, shape index: {}]  }
   0x1   :  { %1178 = sst [smem:[#allocation13_spill]] %s1171_s2 }
   0x2   :  { %9 = vsyncpa [#allocation3], 0 }
   0x3   :  { %11 = vsyncpa [#allocation3 + $0x1], 0 }
   0x4   :  { %12 = vsyncpa [#allocation6], 0 }
   0x5   :  { %14 = vsyncpa [#allocation6 + $0x1], 0 }
   0x6   :  { %15 = vsyncpa [#allocation4], 0 }
   0x7   :  { %17 = vsyncpa [#allocation4 + $0x1], 0  ;;  %s931_s15 = smov 0   ;;  %s933_s16 = smov 0  }
   0x8   :  { %s935_s17 = smov 0   ;;  %s937_s18 = smov 0  }
   0x9 LB: > { %s952_s19 = sadd.s32 4294967295, %s894_s18   ;;  %s559_s20 = sadd.s32 4294967294, %s894_s18   ;;  %s894_s18 = sphi %s937_s18, %s1197_s18   ;;  %s890_s17 = sphi %s935_s17, %s1196_s17   ;;  %s886_s16 = sphi %s933_s16, %s1195_s16   ;;  %s882_s15 = sphi %s931_s15, %s1194_s15  }
   0xa   : > { %p43_p0 = scmp.ne.s32.totalorder %s886_s16, %s882_s15  ;;  %p1174_p1 = scmp.eq.s32.totalorder %s952_s19, 0 }
   0xb   : > { %p141_p3 = scmp.eq.s32.totalorder %s559_s20, 1  ;;  %p560_p5 = scmp.ge.s32.totalorder %s894_s18, 1 }
   0xc   : > { %p961_p4 = por %p1174_p1, %p43_p0  ;;  %p148_p7 = scmp.lt.s32.totalorder %s894_s18, 3 }
   0xd   : > { %p966_p6 = por %p141_p3, %p43_p0  ;;  %s896_s24 = smov [#allocation7]  }
   0xe   : > { %s1179_s21 = scalar_select %p961_p4, 1, 0 }
   0xf   : > { %s1180_s22 = scalar_select %p966_p6, 1, 0 }
  0x10   : > { %p971_p8 = pnand %p560_p5, %p148_p7  ;;  %s160_s25 = sshll.u32 %s896_s24, 4  ;;  %s975_s25 = int_to_ptr.vmem [resolvable:$true] %s160_s25 }
  0x11   : > { %s987_s27 = sadd.s32 1, %s894_s18   ;;  %s30_s28 = sadd.s32 1, %s890_s17 }
  0x12   : > { %s1181_s23 = scalar_select %p971_p8, 1, 0 }
  0x13   : > { %p671_p9 = pneg %p971_p8  ;;  %s27_s29 = ssub.s32 %s894_s18, %s987_s27 }
  0x14   : > { %s1183_s2 = sld [smem:[#allocation13_spill]] }
  0x15   : > { %p982_p11 = pnand %p671_p9, %p1174_p1 }
  0x17   : > { %p734_p13 = pneg %p982_p11 }
  0x1a   : > { %s732_s6 = scalar_lea.hbm %s1183_s2, 2048 }
  0x1b   : > { %p733_p12 = scmp.ne.s32.totalorder %s1183_s2, %s732_s6  ;;  %p739_p5 = scmp.lt.u32.totalorder %s732_s6, %s1183_s2 }
  0x1d   : > { %p735_p0 = pnand %p734_p13, %p733_p12 }
  0x1f   : > { %p736_p3 = pneg %p735_p0 }
  0x21   : > { %p741_p7 = pnand %p739_p5, %p736_p3 }
  0x23   : > { %744 = shalt.err (!%p741_p7)
}
  0x24   : > { %s745_s11 = scalar_lea.vmem %s975_s25, 2048  ;;  %p753_p2 = scmp.lt.s32.totalorder %s975_s25, %s975_s25 }
  0x25   : > { %p746_p9 = scmp.ne.s32.totalorder %s975_s25, %s745_s11  ;;  %p754_p6 = scmp.lt.s32.totalorder %s745_s11, %s745_s11 }
  0x27   : > { %p748_p10 = pnand %p746_p9, %p734_p13  ;;  %p755_p4 = por %p754_p6, %p753_p2 }
  0x29   : > { %p749_p1 = pneg %p748_p10 }
  0x2b   : > { %p756_p8 = pnand %p755_p4, %p749_p1 }
  0x2d   : > { %759 = shalt.err (!%p756_p8)
}
  0x2e   : > { %s897_s12 = smov 128   ;;  %s898_s13 = smov 8  }
  0x2f   : > { %674 = dma.hbm_to_vmem [thread:$0]  (!%p982_p11), %s1183_s2, 2048, %s975_s25, [#allocation6], %s897_s12, %s897_s12, %s898_s13  }
  0x30   : > { %p28_p2 = scmp.eq.s32.totalorder %s27_s29, 0  ;;  %p37_p1 = scmp.ne.s32.totalorder %s890_s17, %s886_s16 }
  0x31   : > { %p38_p4 = scmp.eq.s32.totalorder %s894_s18, 0  ;;  %p687_p6 = scmp.lt.s32.totalorder %s894_s18, 2 }
  0x32   : > { %s1018_s24 = scalar_select %p28_p2, %s890_s17, %s30_s28  }
  0x33   : > { %p39_p8 = por %p38_p4, %p37_p1  ;;  %p1184_p10 = scmp.eq.s32.totalorder %s952_s19, 1 }
  0x34   : > { %s177_s5 = sand.u32 1, %s890_s17   ;;  %s564_s6 = sshll.u32 %s894_s18, 7 }
  0x35   : > { %p1022_p12 = por %p1184_p10, %p37_p1  ;;  %s1028_s7 = sshll.u32 %s177_s5, 3 }
  0x36   : > { %s1033_s25 = scalar_lea.hbm %s1169_s0, %s564_s6  ;;  %s181_s28 = scalar_lea.vmem [#allocation2], %s1028_s7 }
  0x37   : > { %s1185_s30 = scalar_select %p1022_p12, 1, 0 }
  0x38   : > { %s188_s29 = sshll.u32 %s181_s28, 4  ;;  %p1036_p11 = pnand %p687_p6, %p39_p8  ;;  %s1040_s29 = int_to_ptr.vmem [resolvable:$true] %s188_s29 }
  0x39   : > { %s1045_s12 = scalar_lea.hbm %s1170_s1, %s564_s6  ;;  %s178_s13 = scalar_lea.sflag [#allocation3], %s177_s5 }
  0x3a   : > { %s760_s14 = scalar_lea.hbm %s1033_s25, 128  ;;  %p762_p0 = pneg %p1036_p11 }
  0x3b   : > { %p761_p13 = scmp.ne.s32.totalorder %s1033_s25, %s760_s14  ;;  %s765_s8 = scalar_lea.hbm %s1169_s0, 256 }
  0x3c   : > { %p766_p7 = scmp.lt.u32.totalorder %s1033_s25, %s1169_s0  ;;  %p767_p9 = scmp.lt.u32.totalorder %s765_s8, %s760_s14 }
  0x3d   : > { %p763_p3 = pnand %p762_p0, %p761_p13  ;;  %p769_p1 = scmp.lt.u32.totalorder %s760_s14, %s1033_s25 }
  0x3e   : > { %p768_p2 = por %p767_p9, %p766_p7 }
  0x3f   : > { %p764_p5 = pneg %p763_p3 }
  0x40   : > { %p770_p4 = por %p769_p1, %p768_p2 }
  0x42   : > { %p771_p6 = pnand %p770_p4, %p764_p5 }
  0x44   : > { %774 = shalt.err (!%p771_p6)
}
  0x45   : > { %s775_s5 = scalar_lea.vmem %s1040_s29, 128  ;;  %s899_s6 = smov [#allocation2]  }
  0x46   : > { %p776_p8 = scmp.ne.s32.totalorder %s1040_s29, %s775_s5  ;;  %s780_s10 = sshll.u32 %s899_s6, 4  ;;  %s781_s10 = int_to_ptr.vmem [resolvable:$false] %s780_s10 }
  0x47   : > { %s782_s2 = scalar_lea.vmem %s781_s10, 256  ;;  %p783_p3 = scmp.lt.s32.totalorder %s1040_s29, %s781_s10 }
  0x48   : > { %p778_p10 = pnand %p776_p8, %p762_p0  ;;  %p784_p7 = scmp.lt.s32.totalorder %s782_s2, %s775_s5 }
  0x4a   : > { %p779_p13 = pneg %p778_p10  ;;  %p785_p9 = por %p784_p7, %p783_p3 }
  0x4c   : > { %p786_p2 = pnand %p785_p9, %p779_p13 }
  0x4e   : > { %789 = shalt.err (!%p786_p2)
}
  0x4f   : > { %678 = dma.hbm_to_vmem [thread:$0]  (!%p1036_p11), %s1033_s25, 128, %s1040_s29, %s178_s13  }
  0x50   : > { %s195_s11 = sand.u32 1, %s894_s18   ;;  %s199_s14 = scalar_lea.vmem [#allocation5], %s1028_s7 }
  0x51   : > { %s206_s20 = sshll.u32 %s199_s14, 4  ;;  %s196_s26 = scalar_lea.sflag [#allocation6], %s195_s11  ;;  %s207_s20 = int_to_ptr.vmem [resolvable:$true] %s206_s20 }
  0x52   : > { %s790_s8 = scalar_lea.hbm %s1045_s12, 128  ;;  %s795_s6 = scalar_lea.hbm %s1170_s1, 256 }
  0x53   : > { %p791_p5 = scmp.ne.s32.totalorder %s1045_s12, %s790_s8  ;;  %p796_p6 = scmp.lt.u32.totalorder %s1045_s12, %s1170_s1 }
  0x54   : > { %p797_p8 = scmp.lt.u32.totalorder %s795_s6, %s790_s8  ;;  %p799_p13 = scmp.lt.u32.totalorder %s790_s8, %s1045_s12 }
  0x55   : > { %p793_p1 = pnand %p791_p5, %p762_p0 }
  0x56   : > { %p798_p10 = por %p797_p8, %p796_p6 }
  0x57   : > { %p794_p4 = pneg %p793_p1 }
  0x58   : > { %p800_p3 = por %p799_p13, %p798_p10 }
  0x5a   : > { %p801_p7 = pnand %p800_p3, %p794_p4 }
  0x5c   : > { %804 = shalt.err (!%p801_p7)
}
  0x5d   : > { %s805_s7 = scalar_lea.vmem %s207_s20, 128  ;;  %s900_s25 = smov [#allocation5]  }
  0x5e   : > { %p806_p9 = scmp.ne.s32.totalorder %s207_s20, %s805_s7  ;;  %s810_s29 = sshll.u32 %s900_s25, 4  ;;  %s811_s29 = int_to_ptr.vmem [resolvable:$false] %s810_s29 }
  0x5f   : > { %s812_s13 = scalar_lea.vmem %s811_s29, 256  ;;  %p813_p1 = scmp.lt.s32.totalorder %s207_s20, %s811_s29 }
  0x60   : > { %p808_p2 = pnand %p806_p9, %p762_p0  ;;  %p814_p12 = scmp.lt.s32.totalorder %s812_s13, %s805_s7 }
  0x62   : > { %p809_p5 = pneg %p808_p2  ;;  %p815_p6 = por %p814_p12, %p813_p1 }
  0x64   : > { %p816_p8 = pnand %p815_p6, %p809_p5 }
  0x66   : > { %819 = shalt.err (!%p816_p8)
}
  0x67   : > { %681 = dma.hbm_to_vmem [thread:$0]  (!%p1036_p11), %s1045_s12, 128, %s207_s20, %s196_s26  }
  0x68   : > { %p1187_p4 = scmp.ne.s32.totalorder %s1181_s23, 0 }
  0x69   : > { %s1096_s11 = sand.u32 (!%p1187_p4), 1, %s886_s16   ;;  %p1188_p12 = scmp.ne.s32.totalorder (!%p1187_p4), %s1179_s21, 0 }
  0x6a   : > { %215 = sbr.rel (%p1187_p4) target bundleno = 568 (0x238), region = 36  ;;  %s1099_s14 = sshll.u32 (!%p1187_p4), %s1096_s11, 3 }
  0x6b   : > { %s218_s8 = scalar_lea.sflag (!%p1187_p4), [#allocation3], %s1096_s11  ;;  %s221_s28 = scalar_lea.vmem (!%p1187_p4), [#allocation2], %s1099_s14 }
  0x71   : > { %865 = dma.done.wait (%p1188_p12), %s218_s8, 128  }
  0x72   : > { %867 = vsyncadd (%p1188_p12), %s218_s8, 4294967168  ;;  %s226_s23 = sand.u32 1, %s952_s19   ;;  %s230_s12 = scalar_lea.vmem [#allocation5], %s1099_s14 }
  0x73   : > { %s227_s9 = scalar_lea.sflag [#allocation6], %s226_s23 }
  0x74   : > { %869 = dma.done.wait (%p1188_p12), %s227_s9, 128  }
  0x75   : > { %871 = vsyncadd (%p1188_p12), %s227_s9, 4294967168  ;;  %p1189_p11 = scmp.eq.s32.totalorder %s952_s19, 0 }
  0x77   : > { %873 = dma.done.wait (%p1189_p11), [#allocation6], 2048   ;;  %p1190_p0 = pmov %p1189_p11 }
  0x78   : > { %v901_v0 = vmov 0.0   ;;  %vm902_vm0 = vmmov 0   ;;  %v903_v1 = vmov 0.0|0.0   ;;  %vm283_vm1 = vcmask 64512   ;;  %v264_v2 = vld [vmem:[%s221_s28] sm:$0xff]  ;;  %v265_v3 = vld [vmem:[%s230_s12] sm:$0xff] }
  0x79   : > { %875 = vsyncadd (%p1190_p0), [#allocation6], 4294965248  ;;  %597 = vmatprep.subr.mxu0 %v901_v0  ;;  %599 = vmatprep.mubr.msk.f32.mxu0 %vm902_vm0, %v901_v0  ;;  %v266_v4 = vld [vmem:[#allocation7] sm:$0xff]  ;;  %v267_v5 = vld [vmem:[#allocation7 + $0x8] sm:$0xff]  ;;  %v904_v28 = vmov 16   ;;  %s575_s26 = sshll.u32 %s952_s19, 7 }
  0x7a   : > { %637 = vmatprep.subr.bf16.mxu1 %v903_v1  ;;  %634 = vmatprep.mubr.msk.f32.mxu1 %vm902_vm0, %v901_v0  ;;  %v268_v6 = vld [vmem:[#allocation7 + $0x10] sm:$0xff]  ;;  %v269_v7 = vld [vmem:[#allocation7 + $0x18] sm:$0xff]  ;;  %v638_v8 = vpack.c.bf16 %v267_v5, %v266_v4  ;;  %v270_v10 = vld [vmem:[#allocation7 + $0x20] sm:$0xff]  ;;  %s263_s5 = scalar_lea.vmem [#allocation8], %s1099_s14  ;;  %s1125_s7 = scalar_lea.hbm %s1173_s4, %s575_s26 }
  0x7b   : > { %598 = vmatpush3.msra.mxu0 %v264_v2  ;;  %v641_v9 = vpack.c.bf16 %v269_v7, %v268_v6  ;;  %v271_v11 = vld [vmem:[#allocation7 + $0x28] sm:$0xff]  ;;  %v272_v13 = vld [vmem:[#allocation7 + $0x30] sm:$0xff]  ;;  %v273_v14 = vld [vmem:[#allocation7 + $0x38] sm:$0xff]  ;;  %729 = vset.pattern.permute.xlu0 %v904_v28  ;;  %s457_s6 = sshll.u32 %s263_s5, 4  ;;  %s444_s25 = scalar_lea.sflag [#allocation4], %s1096_s11  ;;  %s1127_s6 = int_to_ptr.vmem [resolvable:$true] %s457_s6 }
  0x7c   : > { %600 = vmatmul.mubr.msk.f32.vlgmr.msra.gmra.mrb[0].mxu0 %vm283_vm1, %v265_v3  ;;  %639 = vmatpush3.bf16.msra.mxu1 %v638_v8  ;;  %v644_v12 = vpack.c.bf16 %v271_v11, %v270_v10  ;;  %v647_v15 = vpack.c.bf16 %v273_v14, %v272_v13  ;;  %v274_v16 = vld [vmem:[#allocation7 + $0x40] sm:$0xff]  ;;  %v275_v17 = vld [vmem:[#allocation7 + $0x48] sm:$0xff]  ;;  %v276_v19 = vld [vmem:[#allocation7 + $0x50] sm:$0xff]  ;;  %s820_s29 = scalar_lea.vmem %s1127_s6, 128  ;;  %p1191_p13 = scmp.ne.s32.totalorder %s1185_s30, 0 }
  0x7d   : > { %640 = vmatprep.subr.bf16.mxu1 %v903_v1  ;;  %v650_v18 = vpack.c.bf16 %v275_v17, %v274_v16  ;;  %v277_v20 = vld [vmem:[#allocation7 + $0x58] sm:$0xff]  ;;  %v278_v22 = vld [vmem:[#allocation7 + $0x60] sm:$0xff]  ;;  %v279_v23 = vld [vmem:[#allocation7 + $0x68] sm:$0xff]  ;;  %p821_p10 = scmp.ne.s32.totalorder %s1127_s6, %s820_s29  ;;  %s905_s19 = smov [#allocation8]  }
  0x7e   : > { %v653_v21 = vpack.c.bf16 %v277_v20, %v276_v19  ;;  %v656_v24 = vpack.c.bf16 %v279_v23, %v278_v22  ;;  %v280_v25 = vld [vmem:[#allocation7 + $0x70] sm:$0xff]  ;;  %v281_v26 = vld [vmem:[#allocation7 + $0x78] sm:$0xff]  ;;  %v573_v33 = vld [vmem:[%s1172_s3] ss:$0 sm:$0xff]  ;;  %s824_s13 = sshll.u32 %s905_s19, 4  ;;  %s825_s13 = int_to_ptr.vmem [resolvable:$false] %s824_s13 }
  0x7f   : > { %v659_v27 = vpack.c.bf16 %v281_v26, %v280_v25  ;;  %p822_p3 = pnand %p821_p10, %p1191_p13  ;;  %s826_s14 = scalar_lea.vmem %s825_s13, 256 }
  0x80   : > { %642 = vmatpush3.bf16.msra.mxu1 %v641_v9  ;;  %p827_p9 = scmp.lt.s32.totalorder %s1127_s6, %s825_s13  ;;  %p828_p2 = scmp.lt.s32.totalorder %s826_s14, %s820_s29 }
  0x81   : > { %643 = vmatprep.subr.bf16.mxu1 %v903_v1  ;;  %p823_p7 = pneg %p822_p3 }
  0x82   : > { %p829_p5 = por %p828_p2, %p827_p9 }
  0x84   : > { %645 = vmatpush3.bf16.msra.mxu1 %v644_v12  ;;  %p830_p1 = pnand %p829_p5, %p823_p7 }
  0x85   : > { %646 = vmatprep.subr.bf16.mxu1 %v903_v1 }
  0x88   : > { %648 = vmatpush3.bf16.msra.mxu1 %v647_v15 }
  0x89   : > { %649 = vmatprep.subr.bf16.mxu1 %v903_v1 }
  0x8c   : > { %651 = vmatpush3.bf16.msra.mxu1 %v650_v18 }
  0x8d   : > { %652 = vmatprep.subr.bf16.mxu1 %v903_v1 }
  0x90   : > { %654 = vmatpush3.bf16.msra.mxu1 %v653_v21 }
  0x91   : > { %655 = vmatprep.subr.bf16.mxu1 %v903_v1 }
  0x94   : > { %657 = vmatpush3.bf16.msra.mxu1 %v656_v24 }
  0x95   : > { %658 = vmatprep.subr.bf16.mxu1 %v903_v1 }
  0x98   : > { %660 = vmatpush3.bf16.msra.mxu1 %v659_v27 }
 0x14f   : > { %v353_v29 = vpop.f32.mrb[0].mxu0 }
 0x150   : > { %v601_v30 = vpop.f32.mrb[1].mxu0  ;;  %635 = vmatmul.mubr.f32.vlgmr.msra.gmra.mrb[0].mxu1 %v353_v29  ;;  %v433_v31 = vadd.f32 1.0, %v353_v29 }
 0x152   : > { %436 = vperm.xlu0 %729, %v433_v31  }
 0x1d1   : > { %v437_v32 = vpop.permute.xlu0 %436 }
 0x1d2   : > { %730 = vrcp.f32 %v437_v32 }
 0x1dc   : > { %v731_v37 = vpop.eup %730 }
 0x223   : > { %v429_v34 = vpop.f32.mrb[0].mxu1 }
 0x224   : > { %v430_v35 = vadd.f32 %v573_v33, %v429_v34  ;;  %v636_v36 = vpop.f32.mrb[1].mxu1 }
 0x226   : > { %v440_v38 = vmul.f32 %v731_v37, %v430_v35 }
 0x228   : > { %v441_v39 = vmax.f32 %v440_v38, 0.0 }
 0x22a   : > { %442 = vst [vmem:[%s263_s5] sm:$0xff] %v441_v39 }
 0x22b   : > { %833 = shalt.err (!%p830_p1)
}
 0x22c   : > { %s834_s11 = scalar_lea.hbm %s1125_s7, 128  ;;  %s838_s23 = scalar_lea.hbm %s1173_s4, 256 }
 0x22d   : > { %p835_p6 = scmp.ne.s32.totalorder %s1125_s7, %s834_s11  ;;  %p839_p12 = scmp.lt.u32.totalorder %s1125_s7, %s1173_s4 }
 0x22e   : > { %p840_p11 = scmp.lt.u32.totalorder %s838_s23, %s834_s11  ;;  %p842_p10 = scmp.lt.u32.totalorder %s834_s11, %s1125_s7 }
 0x22f   : > { %p836_p8 = pnand %p835_p6, %p1191_p13 }
 0x230   : > { %p841_p0 = por %p840_p11, %p839_p12 }
 0x231   : > { %p837_p4 = pneg %p836_p8 }
 0x232   : > { %p843_p3 = por %p842_p10, %p841_p0 }
 0x234   : > { %p844_p7 = pnand %p843_p3, %p837_p4 }
 0x236   : > { %847 = shalt.err (!%p844_p7)
}
 0x237   : > { %669 = dma.vmem_to_hbm [thread:$0]  (%p1191_p13), %s1127_s6, 128, %s1125_s7, %s444_s25  }
 0x238 PF: > { %s469_s21 = sand.u32 1, %s882_s15   ;;  %p1192_p9 = scmp.ne.s32.totalorder %s1180_s22, 0 }
 0x239   : > { %p1193_p2 = scmp.ge.s32.totalorder %s894_s18, 2  ;;  %s470_s20 = scalar_lea.sflag [#allocation4], %s469_s21 }
 0x23b   : > { %p683_p5 = pnand %p1193_p2, %p1192_p9 }
 0x23d   : > { %877 = dma.done.wait (!%p683_p5), %s470_s20, 128  }
 0x23e   : > { %879 = vsyncadd (!%p683_p5), %s470_s20, 4294967168  ;;  %p20_p1 = scmp.ge.s32.totalorder %s987_s27, 4   ;;  %s1194_s15 = smov %s886_s16 }
 0x23f   : > { %s1195_s16 = smov %s890_s17  ;;  %s1196_s17 = smov %s1018_s24 }
 0x240   : > { %s1197_s18 = smov %s987_s27  ;;  %22 = sbr.rel (!%p20_p1) target bundleno = 9 (0x9), region = 98 }
 0x247   :  { %475 = vsyncpa [#allocation3], 1 }
 0x248   :  { %477 = vsyncpa [#allocation3 + $0x1], 1 }
 0x249   :  { %478 = vsyncpa [#allocation6], 1 }
 0x24a   :  { %480 = vsyncpa [#allocation6 + $0x1], 1 }
 0x24b   :  { %481 = vsyncpa [#allocation4], 1 }
 0x24c   :  { %483 = vsyncpa [#allocation4 + $0x1], 1 }

</bundles_post_ra>
